<compile_context>
chip_gen: v6e
topology: v6e:2x2x1
jax: 0.10.0
libtpu: 0.0.40
codegen_flags: <defaults>
</compile_context>

<pallas_src>
import math

import jax
import jax.numpy as jnp
import numpy as np
from jax.experimental import pallas as pl
from jax.experimental.pallas import tpu as pltpu


def _round_up(x, m):
    return ((x + m - 1) // m) * m


def _graph_linear_kernel(x_ref, w_ref, b_ref, o_ref):
    """x: (tm, Kp) bf16, w: (Kp, Kp) bf16, b: (1, Kp) f32, o: (tm, Kp) f32."""
    y = jnp.dot(x_ref[...], w_ref[...], preferred_element_type=jnp.float32)
    o_ref[...] = (jnp.tanh(y) + b_ref[...]).astype(o_ref.dtype)


def _pick_row_tile(M, row_tile):
    if M <= 8:
        return M                                   # single full-extent block
    # At least two grid steps (v7x megacore), 8-aligned sublane tiles, <= row_tile.
    return max(8, min(row_tile, _round_up(pl.cdiv(M, 2), 8)))


def graph_linear_forward(pos, att, bias, *, row_tile=512,
                         compute_dtype=jnp.bfloat16):
    """GraphLinear.forward.  pos: (B, F, D, N), att: (N, N), bias: (N*D,)."""
    B, F, D, N = pos.shape
    K = N * D
    Kp = _round_up(K, 128)                         # lane-dense padded width
    M = B * F
    pad = Kp - K

    # Wrapper-side layout plumbing: lane-dense (B*F, N*D) slab so the kernel
    # output already has the transpose(2,3).flatten(2) layout.
    x = jnp.swapaxes(pos, 2, 3).reshape(M, K)
    # (pos @ att) followed by the (D, N) transpose/flatten == one matmul
    # against kron(att, I_D).  Tiny expansion for D=3; see header for scale path.
    w = jnp.kron(att.astype(jnp.float32), jnp.eye(D, dtype=jnp.float32))

    x = jnp.pad(x, ((0, 0), (0, pad))).astype(compute_dtype)
    w = jnp.pad(w, ((0, pad), (0, pad))).astype(compute_dtype)
    b = jnp.pad(bias.astype(jnp.float32), (0, pad)).reshape(1, Kp)

    tm = _pick_row_tile(M, row_tile)
    grid = (pl.cdiv(M, tm),)

    in_isz = jnp.dtype(compute_dtype).itemsize
    out_isz = jnp.dtype(pos.dtype).itemsize
    vmem_need = (2 * tm * Kp * in_isz              # x tile, double-buffered
                 + 2 * tm * Kp * out_isz           # out tile, double-buffered
                 + 2 * Kp * Kp * in_isz            # weight (conservatively x2)
                 + 2 * 8 * Kp * 4)                 # bias, sublane-padded
    vmem_limit = int(min(max(2 * vmem_need, 8 * 1024 * 1024), 64 * 1024 * 1024))

    cost = pl.CostEstimate(
        flops=2 * M * Kp * Kp,
        transcendentals=M * Kp,
        bytes_accessed=(M * Kp * (in_isz + out_isz)
                        + Kp * Kp * in_isz + Kp * 4),
    )

    out = pl.pallas_call(
        _graph_linear_kernel,
        out_shape=jax.ShapeDtypeStruct((M, Kp), pos.dtype),
        grid=grid,
        in_specs=[
            pl.BlockSpec((tm, Kp), lambda i: (i, 0)),   # activation row tile
            pl.BlockSpec((Kp, Kp), lambda i: (0, 0)),   # weight, VMEM resident
            pl.BlockSpec((1, Kp), lambda i: (0, 0)),    # bias, VMEM resident
        ],
        out_specs=pl.BlockSpec((tm, Kp), lambda i: (i, 0)),
        compiler_params=pltpu.CompilerParams(
            dimension_semantics=("parallel",),
            vmem_limit_bytes=vmem_limit),
        cost_estimate=cost,
    )(x, w, b)

    return out[:, :K].reshape(B, F, K)


def get_laplacian(graph, normalize=True):
    """Mirror GraphLinear.get_laplacian (init-time, plain JAX)."""
    if normalize:
        d = jnp.sum(graph, axis=-1) ** (-0.5)
        Dm = jnp.diag(d)
        return jnp.eye(graph.shape[0], dtype=graph.dtype) - Dm @ graph @ Dm
    return jnp.diag(jnp.sum(graph, axis=-1)) - graph


def init_graph_linear(key, input_node, out_size, adj):
    """Mirror GraphLinear.reset_parameters (bias=True)."""
    kq, kb = jax.random.split(key)
    adj = jnp.asarray(adj, jnp.float32)
    Q = jax.random.uniform(kq, (input_node, input_node), jnp.float32, 0.01, 0.24)
    A = adj * adj + Q                      # Adj.data * M.data + Q.data (M == adj)
    att = get_laplacian(A, normalize=True)
    stdv = 1.0 / math.sqrt(input_node * 9)
    bias = jax.random.uniform(kb, (out_size,), jnp.float32, -stdv, stdv)
    return dict(att=att, bias=bias)


def graph_linear_ref(pos, att, bias):
    """Pure-JAX f32 reference of the PyTorch forward, for verification."""
    out = jnp.matmul(pos, att)                            # (B, F, D, N)
    B, F = pos.shape[:2]
    out = jnp.swapaxes(out, 2, 3).reshape(B, F, -1)       # (B, F, N*D)
    return jnp.tanh(out) + bias


if __name__ == "__main__":
    key = jax.random.PRNGKey(0)
    kx, kp = jax.random.split(key)

    batch, frames, dim, input_node = 2, 8, 3, 16
    out_size = input_node * dim            # 48; required for the bias broadcast

    # Deterministic ring-graph adjacency (symmetric, no self loops).
    idx = np.arange(input_node)
    adj = np.zeros((input_node, input_node), np.float32)
    adj[idx, (idx + 1) % input_node] = 1.0
    adj[(idx + 1) % input_node, idx] = 1.0

    params = init_graph_linear(kp, input_node, out_size, adj)
    pos = jax.random.normal(kx, (batch, frames, dim, input_node), jnp.float32)

    fwd = jax.jit(graph_linear_forward)
    y = jax.block_until_ready(fwd(pos, params["att"], params["bias"]))

    y_ref = graph_linear_ref(pos, params["att"], params["bias"])
    assert y.shape == (batch, frames, out_size), y.shape
    assert bool(jnp.all(jnp.isfinite(y)))
    # bf16 matmul operands with f32 accumulation -> ~1e-2-level tolerance.
    np.testing.assert_allclose(np.asarray(y), np.asarray(y_ref),
                               atol=2e-2, rtol=2e-2)
    print("KERNEL_OK")
</pallas_src>

<mosaic_0001>
module attributes {stable_mosaic.version = 11 : i64} {
  func.func @_graph_linear_kernel(%arg0: i32, %arg1: memref<8x128xbf16, #tpu.memory_space<vmem>>, %arg2: memref<128x128xbf16, #tpu.memory_space<vmem>>, %arg3: memref<1x128xf32, #tpu.memory_space<vmem>>, %arg4: memref<8x128xf32, #tpu.memory_space<vmem>>) attributes {dimension_semantics = [#tpu.dimension_semantics<parallel>], iteration_bounds = array<i64: 2>, scalar_prefetch = 0 : i64, scratch_operands = 0 : i64, tpu.core_type = #tpu.core_type<tc>, window_params = [{transform_indices = @transform_0, window_bounds = array<i64: 8, 128>}, {pipeline_mode = #tpu.pipeline_mode<synchronous>, transform_indices = @transform_1, window_bounds = array<i64: 128, 128>}, {pipeline_mode = #tpu.pipeline_mode<synchronous>, transform_indices = @transform_2, window_bounds = array<i64: 1, 128>}, {transform_indices = @transform_3, window_bounds = array<i64: 8, 128>}]} {
    %c0 = arith.constant 0 : index
    %c0_0 = arith.constant 0 : index
    %0 = vector.load %arg1[%c0, %c0_0] : memref<8x128xbf16, #tpu.memory_space<vmem>>, vector<8x128xbf16>
    %c0_1 = arith.constant 0 : index
    %c0_2 = arith.constant 0 : index
    %1 = vector.load %arg2[%c0_1, %c0_2] : memref<128x128xbf16, #tpu.memory_space<vmem>>, vector<128x128xbf16>
    %cst = arith.constant dense<0.000000e+00> : vector<8x128xf32>
    %2 = tpu.matmul %0, %1, %cst {dimension_numbers = #tpu.dot_dimension_numbers<[1], [0], [0], [1], [0, 0, 1, 1], [], []>} : vector<8x128xbf16>, vector<128x128xbf16>, vector<8x128xf32> -> vector<8x128xf32>
    %3 = math.tanh %2 : vector<8x128xf32>
    %c0_3 = arith.constant 0 : index
    %c0_4 = arith.constant 0 : index
    %4 = vector.load %arg3[%c0_3, %c0_4] : memref<1x128xf32, #tpu.memory_space<vmem>>, vector<1x128xf32>
    %5 = vector.broadcast %4 : vector<1x128xf32> to vector<8x128xf32>
    %6 = arith.addf %3, %5 : vector<8x128xf32>
    %c0_5 = arith.constant 0 : index
    %c0_6 = arith.constant 0 : index
    %7 = vector.load %arg4[%c0_5, %c0_6] : memref<8x128xf32, #tpu.memory_space<vmem>>, vector<8x128xf32>
    tpu.vector_store %arg4[%c0_5, %c0_6], %6 {strides = array<i32>} : memref<8x128xf32, #tpu.memory_space<vmem>>, vector<8x128xf32>,
    return
  }
  func.func @transform_0(%arg0: i32) -> (i32, i32) {
    %c0_i32 = arith.constant 0 : i32
    %c0_i32_0 = arith.constant 0 : i32
    return %arg0, %c0_i32 : i32, i32
  }
  func.func @transform_1(%arg0: i32) -> (i32, i32) {
    %c0_i32 = arith.constant 0 : i32
    %c0_i32_0 = arith.constant 0 : i32
    %c0_i32_1 = arith.constant 0 : i32
    return %c0_i32, %c0_i32_0 : i32, i32
  }
  func.func @transform_2(%arg0: i32) -> (i32, i32) {
    %c0_i32 = arith.constant 0 : i32
    %c0_i32_0 = arith.constant 0 : i32
    %c0_i32_1 = arith.constant 0 : i32
    return %c0_i32, %c0_i32_0 : i32, i32
  }
  func.func @transform_3(%arg0: i32) -> (i32, i32) {
    %c0_i32 = arith.constant 0 : i32
    %c0_i32_0 = arith.constant 0 : i32
    return %arg0, %c0_i32 : i32, i32
  }
}

</mosaic_0001>

<bundles_post_ra>
// kernel: graph_linear_forward.1
= control target key start
LH: loop header
LB: loop body
LE: loop exit
PB: predicated region body
PF: predicated region fallthrough
CT: control target
= control target key end

     0   :  { %s432_s12 = smov 0   ;;  %s476_s0 = inlined_call_operand.vmem [shape: bf16[16,128], index: 0, kind: input, shape index: {}]   ;;  %s477_s1 = inlined_call_operand.vmem [shape: bf16[128,128], index: 1, kind: input, shape index: {}]   ;;  %s478_s2 = inlined_call_operand.vmem [shape: f32[1,128], index: 2, kind: input, shape index: {}]   ;;  %s479_s3 = inlined_call_operand.vmem [shape: f32[16,128], index: 3, kind: output, shape index: {}]  }
   0x1 LB: > { %s335_s13 = sadd.s32 4294967295, %s408_s12   ;;  %p339_p0 = scmp.ge.s32.totalorder %s408_s12, 1  ;;  %s408_s12 = sphi %s432_s12, %s13_s12  }
   0x2   : > { %p136_p1 = scmp.lt.s32.totalorder %s408_s12, 3 }
   0x4   : > { %p137_p2 = pnand %p339_p0, %p136_p1 }
   0x5   : > { %p158_p3 = scmp.lt.s32.totalorder (!%p137_p2), %s335_s13, 1 }
   0x6   : > { %140 = sbr.rel (%p137_p2) target bundleno = 254 (0xfe), region = 32 }
   0xb   : > { %v392_v0 = vld [vmem:[%s477_s1 + $0x38] sm:$0xff]   ;;  %v410_v1 = vmov 0.0   ;;  %v393_v2 = vld [vmem:[%s477_s1 + $0x30] sm:$0xff]   ;;  %vm411_vm0 = vmmov 0   ;;  %v394_v3 = vld [vmem:[%s477_s1 + $0x28] sm:$0xff]   ;;  %s481_s13 = smov (!%p158_p3, %s335_s13), 1 }
   0xc   : > { %362 = vmatprep.subr.bf16.mxu0 %v410_v1  ;;  %378 = vmatprep.mubr.msk.bf16.mxu0 %vm411_vm0, %v410_v1  ;;  %v395_v4 = vld [vmem:[%s477_s1 + $0x20] sm:$0xff]   ;;  %v396_v5 = vld [vmem:[%s477_s1 + $0x18] sm:$0xff]   ;;  %v397_v6 = vld [vmem:[%s477_s1 + $0x10] sm:$0xff]   ;;  %s340_s28 = sshll.u32 %s481_s13, 2  ;;  %s341_s7 = sshll.u32 %s481_s13, 3 }
   0xd   : > { %363 = vmatpush3.bf16.msra.mxu0 %v392_v0  ;;  %v398_v7 = vld [vmem:[%s477_s1 + $0x8] sm:$0xff]   ;;  %v399_v8 = vld [vmem:[%s477_s1] sm:$0xff]   ;;  %s161_s6 = scalar_lea.vmem %s476_s0, %s340_s28  ;;  %s165_s14 = scalar_lea.vmem %s479_s3, %s341_s7 }
   0xe   : > { %364 = vmatprep.subr.bf16.mxu0 %v410_v1  ;;  %v167_v9 = vld [vmem:[%s161_s6] sm:$0xf] }
   0xf   : > { %v350_v14 = vld [vmem:[%s478_s2] ss:$0 sm:$0xff] }
  0x11   : > { %365 = vmatpush3.bf16.msra.mxu0 %v393_v2 }
  0x12   : > { %366 = vmatprep.subr.bf16.mxu0 %v410_v1 }
  0x15   : > { %367 = vmatpush3.bf16.msra.mxu0 %v394_v3 }
  0x16   : > { %368 = vmatprep.subr.bf16.mxu0 %v410_v1 }
  0x19   : > { %369 = vmatpush3.bf16.msra.mxu0 %v395_v4 }
  0x1a   : > { %370 = vmatprep.subr.bf16.mxu0 %v410_v1 }
  0x1d   : > { %371 = vmatpush3.bf16.msra.mxu0 %v396_v5 }
  0x1e   : > { %372 = vmatprep.subr.bf16.mxu0 %v410_v1 }
  0x21   : > { %373 = vmatpush3.bf16.msra.mxu0 %v397_v6 }
  0x22   : > { %374 = vmatprep.subr.bf16.mxu0 %v410_v1 }
  0x25   : > { %375 = vmatpush3.bf16.msra.mxu0 %v398_v7 }
  0x26   : > { %376 = vmatprep.subr.bf16.mxu0 %v410_v1 }
  0x29   : > { %377 = vmatpush3.bf16.msra.mxu0 %v399_v8 }
  0x2c   : > { %379 = vmatmul.mubr.bf16.vlgmr.msra.gmra.mxu0 %v167_v9 }
  0xec   : > { %v266_v10 = vpop.f32.mrf.mxu0 }
  0xed   : > { %400 = vtanh.f32 %v266_v10 }
  0xee   : > { %v380_v11 = vpop.f32.mrf.mxu0 }
  0xf0   : > { %v269_v12 = vpop.f32.mrf.mxu0 }
  0xf2   : > { %v381_v13 = vpop.f32.mrf.mxu0 }
  0xfa   : > { %v401_v15 = vpop.eup %400 }
  0xfb   : > { %v280_v16 = vadd.f32 %v401_v15, %v350_v14 }
  0xfd   : > { %281 = vst [vmem:[%s165_s14] sm:$0xff] %v280_v16 }
  0xfe PF: > { %s13_s12 = sadd.s32 1, %s408_s12  }
  0xff   : > { %p10_p4 = scmp.ge.s32.totalorder %s13_s12, 4  }
 0x101   :  { %12 = sbr.rel (!%p10_p4) target bundleno = 1 (0x1), region = 62 }

</bundles_post_ra>
